<compile_context>
chip_gen: v7x
topology: tpu7x:2x2x1
jax: 0.10.0
libtpu: 0.0.40
codegen_flags: <defaults>
</compile_context>

<pallas_src>
import functools

import jax
import jax.numpy as jnp
from jax import lax
from jax.experimental import pallas as pl
from jax.experimental.pallas import tpu as pltpu


def _gdkd_kernel(labels_ref, x_ref, t_ref, out_ref, *,
                 alpha, delta, gamma, batch_size, tile_b):
    """Writes this tile's sum of (delta*tckd + gamma*nckd) to out_ref[tile, 0].

    labels_ref: (TILE_B, 1) int32   -- true class index per row
    x_ref:      (TILE_B, C) floats  -- student ("input") logits
    t_ref:      (TILE_B, C) floats  -- teacher ("target") logits
    out_ref:    (num_tiles, 1) f32 in SMEM -- per-tile partial sums
    """
    tile = pl.program_id(0)
    labels = labels_ref[...]                          # (TB, 1) int32
    x = x_ref[...].astype(jnp.float32)                # student logits
    t = t_ref[...].astype(jnp.float32)                # teacher logits
    TB, C = x.shape
    eps = 1e-6

    # target-class mask built in-kernel from broadcasted iota
    cls_ids = lax.broadcasted_iota(jnp.int32, (TB, C), 1)
    is_tgt = cls_ids == labels                        # (TB, C) bool

    # ---- single stable exp pass per tensor -------------------------------
    m_t = jnp.max(t, axis=1, keepdims=True)           # (TB, 1)
    m_x = jnp.max(x, axis=1, keepdims=True)
    e_t = jnp.exp(t - m_t)                            # (TB, C)  EUP pass #1
    e_x = jnp.exp(x - m_x)                            # (TB, C)  EUP pass #2
    s_t = jnp.sum(e_t, axis=1, keepdims=True)         # (TB, 1)
    s_x = jnp.sum(e_x, axis=1, keepdims=True)
    et_tgt = jnp.sum(jnp.where(is_tgt, e_t, 0.0), axis=1, keepdims=True)
    ex_tgt = jnp.sum(jnp.where(is_tgt, e_x, 0.0), axis=1, keepdims=True)

    # target-class probabilities (== exp(t_tgt)/sum(exp(t)), but overflow-safe)
    p_t = et_tgt / s_t                                # (TB, 1)
    q_t = ex_tgt / s_x

    b1 = p_t + eps
    b2 = (1.0 - p_t) + eps
    d1 = q_t + eps
    d2 = (1.0 - q_t) + eps

    # non-target softmax denominators (target class excluded)
    den_t = jnp.maximum(s_t - et_tgt, 1e-30)          # (TB, 1)
    den_x = jnp.maximum(s_x - ex_tgt, 1e-30)
    log_den_t = jnp.log(den_t)                        # per-row scalars only
    log_den_x = jnp.log(den_x)

    if alpha == 1:
        # DKD branch: KL divergences (alpha=delta, beta=gamma in DKD terms).
        tckd = b1 * jnp.log(b1 / d1) + b2 * jnp.log(b2 / d2)      # (TB, 1)
        # log p_hat / log q_hat over non-target classes, from log-softmax form
        logp = (t - m_t) - log_den_t
        logq = (x - m_x) - log_den_x
        inv_den_t = 1.0 / den_t                       # per-row reciprocal
        p_nt = e_t * inv_den_t                        # broadcast multiply
        contrib = jnp.where(is_tgt, 0.0, p_nt * (logp - logq))
        nckd = jnp.sum(contrib, axis=1, keepdims=True)
        # target entry contributes eps*log(eps/eps) ~= 0 in the reference.
    else:
        inv = 1.0 / (alpha - 1.0)
        # (TB, 1) pows are per-row scalars -> trivially cheap.
        tckd = inv * jnp.log(b1 ** alpha * d1 ** (1.0 - alpha)
                             + b2 ** alpha * d2 ** (1.0 - alpha))  # (TB, 1)
        # p_hat^a * q_hat^(1-a) = exp(a*logp + (1-a)*logq) on non-target cols
        z = (alpha * ((t - m_t) - log_den_t)
             + (1.0 - alpha) * ((x - m_x) - log_den_x))
        pq = jnp.where(is_tgt, 0.0, jnp.exp(z))       # EUP pass #3 (only one)
        # target entry of the reference sum is (~eps)^a * (~eps)^(1-a) = eps
        inner = jnp.sum(pq, axis=1, keepdims=True) + eps
        nckd = inv * jnp.log(inner)

    per_row = delta * tckd + gamma * nckd             # (TB, 1)

    # mask rows beyond the true batch size (ragged last tile)
    row_ids = tile * tile_b + lax.broadcasted_iota(jnp.int32, (TB, 1), 0)
    per_row = jnp.where(row_ids < batch_size, per_row, 0.0)

    out_ref[tile, 0] = jnp.sum(per_row)


def gdkd_loss(input_logits, target_logits, true_labels,
              alpha=0.5, delta=1.0, gamma=1.0, max_tile_b=512):
    """Pallas wrapper replicating GDKD.forward (and the DKD branch when alpha==1).

    Inputs are streamed in their native dtype (f32 or bf16); the kernel casts
    to f32 internally.  The batch is tiled in chunks of up to `max_tile_b`
    rows; per-tile partial sums land in SMEM and the mean is taken here.
    """
    B, C = input_logits.shape
    labels2d = true_labels.astype(jnp.int32).reshape(B, 1)

    if B <= max_tile_b:
        tile_b = B                                   # single tile == full dims
    else:
        tile_b = max_tile_b - (max_tile_b % 8) or 8  # sublane-aligned tile
    num_tiles = pl.cdiv(B, tile_b)

    kernel = functools.partial(
        _gdkd_kernel, alpha=float(alpha), delta=float(delta),
        gamma=float(gamma), batch_size=B, tile_b=tile_b)

    partial_sums = pl.pallas_call(
        kernel,
        out_shape=jax.ShapeDtypeStruct((num_tiles, 1), jnp.float32),
        grid=(num_tiles,),
        in_specs=[
            pl.BlockSpec((tile_b, 1), lambda i: (i, 0)),   # labels
            pl.BlockSpec((tile_b, C), lambda i: (i, 0)),   # student logits
            pl.BlockSpec((tile_b, C), lambda i: (i, 0)),   # teacher logits
        ],
        # Whole partial-sum vector stays resident in SMEM across the grid.
        out_specs=pl.BlockSpec(memory_space=pltpu.MemorySpace.SMEM),
        compiler_params=pltpu.CompilerParams(
            dimension_semantics=("arbitrary",)),
        # NOTE: for very large C (LLM vocab) also tile over C with an online
        # running max/sum; default scoped VMEM (and v7x's 64 MiB) then bounds
        # tile_b.  vmem_limit_bytes can be raised here on v5e/v6e for bigger
        # tiles.  # TODO(synk): add C-axis (flash-style) tiling for vocab-scale C.
    )(labels2d, input_logits, target_logits)

    return jnp.sum(partial_sums) / B


def _gdkd_reference(input_logits, target_logits, true_labels,
                    alpha=0.5, delta=1.0, gamma=1.0):
    """Pure-JAX reference mirroring the PyTorch module for correctness checking."""
    x = input_logits.astype(jnp.float32)
    t = target_logits.astype(jnp.float32)
    B, C = x.shape
    eps = 1e-6
    mask = jax.nn.one_hot(true_labels, C, dtype=jnp.float32)
    p_t = jnp.exp(jnp.sum(t * mask, axis=1, keepdims=True)) / jnp.sum(jnp.exp(t), 1, keepdims=True)
    q_t = jnp.exp(jnp.sum(x * mask, axis=1, keepdims=True)) / jnp.sum(jnp.exp(x), 1, keepdims=True)
    b = jnp.concatenate([p_t, 1 - p_t], axis=1) + eps
    d = jnp.concatenate([q_t, 1 - q_t], axis=1) + eps
    p_hat = jax.nn.softmax(t - 1000.0 * mask, axis=1) + eps * mask
    q_hat = jax.nn.softmax(x - 1000.0 * mask, axis=1) + eps * mask
    if alpha == 1:
        tckd = jnp.sum(b * jnp.log(b / d), axis=1)
        nckd = jnp.sum(p_hat * jnp.log(p_hat / q_hat), axis=1)
    else:
        inv = 1.0 / (alpha - 1.0)
        tckd = inv * jnp.log(jnp.sum(b ** alpha * d ** (1 - alpha), axis=1))
        nckd = inv * jnp.log(jnp.sum(p_hat ** alpha * q_hat ** (1 - alpha), axis=1))
    return jnp.mean(delta * tckd + gamma * nckd)


if __name__ == "__main__":
    key = jax.random.PRNGKey(0)
    k1, k2, k3 = jax.random.split(key, 3)

    # Small demo shape (single tile).
    B, C = 8, 32
    input_logits = jax.random.normal(k1, (B, C), dtype=jnp.float32)
    target_logits = jax.random.normal(k2, (B, C), dtype=jnp.float32)
    true_labels = jax.random.randint(k3, (B,), 0, C, dtype=jnp.int32)

    loss = jax.block_until_ready(
        gdkd_loss(input_logits, target_logits, true_labels, alpha=0.5))
    ref = _gdkd_reference(input_logits, target_logits, true_labels, alpha=0.5)
    assert jnp.allclose(loss, ref, rtol=1e-4, atol=1e-5), (loss, ref)

    # DKD branch (alpha == 1).
    loss_dkd = jax.block_until_ready(
        gdkd_loss(input_logits, target_logits, true_labels, alpha=1.0))
    ref_dkd = _gdkd_reference(input_logits, target_logits, true_labels, alpha=1.0)
    assert jnp.allclose(loss_dkd, ref_dkd, rtol=1e-4, atol=1e-5), (loss_dkd, ref_dkd)

    # Multi-tile grid path with a ragged last tile (exercises batch tiling + masking).
    k4, k5, k6 = jax.random.split(jax.random.PRNGKey(1), 3)
    B2, C2 = 20, 128
    x2 = jax.random.normal(k4, (B2, C2), dtype=jnp.float32)
    t2 = jax.random.normal(k5, (B2, C2), dtype=jnp.float32)
    y2 = jax.random.randint(k6, (B2,), 0, C2, dtype=jnp.int32)
    loss2 = jax.block_until_ready(gdkd_loss(x2, t2, y2, alpha=0.5, max_tile_b=8))
    ref2 = _gdkd_reference(x2, t2, y2, alpha=0.5)
    assert jnp.allclose(loss2, ref2, rtol=1e-4, atol=1e-5), (loss2, ref2)

    print("KERNEL_OK")
</pallas_src>

<mosaic_0001>
module attributes {stable_mosaic.version = 11 : i64} {
  func.func @_gdkd_kernel(%arg0: i32, %arg1: memref<8x1xi32, #tpu.memory_space<vmem>>, %arg2: memref<8x32xf32, #tpu.memory_space<vmem>>, %arg3: memref<8x32xf32, #tpu.memory_space<vmem>>, %arg4: memref<1x1xf32, #tpu.memory_space<smem>>) attributes {dimension_semantics = [#tpu.dimension_semantics<arbitrary>], iteration_bounds = array<i64: 1>, scalar_prefetch = 0 : i64, scratch_operands = 0 : i64, tpu.core_type = #tpu.core_type<tc>, window_params = [{transform_indices = @transform_0, window_bounds = array<i64: 8, 1>}, {transform_indices = @transform_1, window_bounds = array<i64: 8, 32>}, {transform_indices = @transform_2, window_bounds = array<i64: 8, 32>}, {transform_indices = @transform_3, window_bounds = array<i64: 1, 1>}]} {
    %c0 = arith.constant 0 : index
    %c0_0 = arith.constant 0 : index
    %0 = vector.load %arg1[%c0, %c0_0] : memref<8x1xi32, #tpu.memory_space<vmem>>, vector<8x1xi32>
    %c0_1 = arith.constant 0 : index
    %c0_2 = arith.constant 0 : index
    %1 = vector.load %arg2[%c0_1, %c0_2] : memref<8x32xf32, #tpu.memory_space<vmem>>, vector<8x32xf32>
    %c0_3 = arith.constant 0 : index
    %c0_4 = arith.constant 0 : index
    %2 = vector.load %arg3[%c0_3, %c0_4] : memref<8x32xf32, #tpu.memory_space<vmem>>, vector<8x32xf32>
    %3 = tpu.iota {dimensions = array<i32: 1>} : vector<8x32xi32>
    %4 = vector.broadcast %0 : vector<8x1xi32> to vector<8x32xi32>
    %5 = arith.cmpi eq, %3, %4 : vector<8x32xi32>
    %cst = arith.constant dense<0xFF800000> : vector<8xf32>
    %6 = vector.multi_reduction <maximumf>, %2, %cst [1] : vector<8x32xf32> to vector<8xf32>
    %7 = vector.shape_cast %6 : vector<8xf32> to vector<8x1xf32>
    %cst_5 = arith.constant dense<0xFF800000> : vector<8xf32>
    %8 = vector.multi_reduction <maximumf>, %1, %cst_5 [1] : vector<8x32xf32> to vector<8xf32>
    %9 = vector.shape_cast %8 : vector<8xf32> to vector<8x1xf32>
    %10 = vector.broadcast %7 : vector<8x1xf32> to vector<8x32xf32>
    %11 = arith.subf %2, %10 : vector<8x32xf32>
    %12 = math.exp %11 : vector<8x32xf32>
    %13 = vector.broadcast %9 : vector<8x1xf32> to vector<8x32xf32>
    %14 = arith.subf %1, %13 : vector<8x32xf32>
    %15 = math.exp %14 : vector<8x32xf32>
    %cst_6 = arith.constant dense<0.000000e+00> : vector<8xf32>
    %16 = vector.multi_reduction <add>, %12, %cst_6 [1] : vector<8x32xf32> to vector<8xf32>
    %17 = vector.shape_cast %16 : vector<8xf32> to vector<8x1xf32>
    %cst_7 = arith.constant dense<0.000000e+00> : vector<8xf32>
    %18 = vector.multi_reduction <add>, %15, %cst_7 [1] : vector<8x32xf32> to vector<8xf32>
    %19 = vector.shape_cast %18 : vector<8xf32> to vector<8x1xf32>
    %cst_8 = arith.constant 0.000000e+00 : f32
    %20 = vector.broadcast %cst_8 : f32 to vector<8x32xf32>
    %21 = arith.select %5, %12, %20 : vector<8x32xi1>, vector<8x32xf32>
    %cst_9 = arith.constant dense<0.000000e+00> : vector<8xf32>
    %22 = vector.multi_reduction <add>, %21, %cst_9 [1] : vector<8x32xf32> to vector<8xf32>
    %23 = vector.shape_cast %22 : vector<8xf32> to vector<8x1xf32>
    %cst_10 = arith.constant 0.000000e+00 : f32
    %24 = vector.broadcast %cst_10 : f32 to vector<8x32xf32>
    %25 = arith.select %5, %15, %24 : vector<8x32xi1>, vector<8x32xf32>
    %cst_11 = arith.constant dense<0.000000e+00> : vector<8xf32>
    %26 = vector.multi_reduction <add>, %25, %cst_11 [1] : vector<8x32xf32> to vector<8xf32>
    %27 = vector.shape_cast %26 : vector<8xf32> to vector<8x1xf32>
    %28 = arith.divf %23, %17 : vector<8x1xf32>
    %29 = arith.divf %27, %19 : vector<8x1xf32>
    %cst_12 = arith.constant 9.99999997E-7 : f32
    %30 = vector.broadcast %cst_12 : f32 to vector<8x1xf32>
    %31 = arith.addf %28, %30 : vector<8x1xf32>
    %cst_13 = arith.constant 1.000000e+00 : f32
    %32 = vector.broadcast %cst_13 : f32 to vector<8x1xf32>
    %33 = arith.subf %32, %28 : vector<8x1xf32>
    %cst_14 = arith.constant 9.99999997E-7 : f32
    %34 = vector.broadcast %cst_14 : f32 to vector<8x1xf32>
    %35 = arith.addf %33, %34 : vector<8x1xf32>
    %cst_15 = arith.constant 9.99999997E-7 : f32
    %36 = vector.broadcast %cst_15 : f32 to vector<8x1xf32>
    %37 = arith.addf %29, %36 : vector<8x1xf32>
    %cst_16 = arith.constant 1.000000e+00 : f32
    %38 = vector.broadcast %cst_16 : f32 to vector<8x1xf32>
    %39 = arith.subf %38, %29 : vector<8x1xf32>
    %cst_17 = arith.constant 9.99999997E-7 : f32
    %40 = vector.broadcast %cst_17 : f32 to vector<8x1xf32>
    %41 = arith.addf %39, %40 : vector<8x1xf32>
    %42 = arith.subf %17, %23 : vector<8x1xf32>
    %cst_18 = arith.constant 1.000000e-30 : f32
    %43 = vector.broadcast %cst_18 : f32 to vector<8x1xf32>
    %44 = arith.maximumf %42, %43 : vector<8x1xf32>
    %45 = arith.subf %19, %27 : vector<8x1xf32>
    %cst_19 = arith.constant 1.000000e-30 : f32
    %46 = vector.broadcast %cst_19 : f32 to vector<8x1xf32>
    %47 = arith.maximumf %45, %46 : vector<8x1xf32>
    %48 = math.log %44 : vector<8x1xf32>
    %49 = math.log %47 : vector<8x1xf32>
    %cst_20 = arith.constant 5.000000e-01 : f32
    %50 = vector.broadcast %cst_20 : f32 to vector<8x1xf32>
    %51 = math.powf %31, %50 : vector<8x1xf32>
    %cst_21 = arith.constant 5.000000e-01 : f32
    %52 = vector.broadcast %cst_21 : f32 to vector<8x1xf32>
    %53 = math.powf %37, %52 : vector<8x1xf32>
    %54 = arith.mulf %51, %53 : vector<8x1xf32>
    %cst_22 = arith.constant 5.000000e-01 : f32
    %55 = vector.broadcast %cst_22 : f32 to vector<8x1xf32>
    %56 = math.powf %35, %55 : vector<8x1xf32>
    %cst_23 = arith.constant 5.000000e-01 : f32
    %57 = vector.broadcast %cst_23 : f32 to vector<8x1xf32>
    %58 = math.powf %41, %57 : vector<8x1xf32>
    %59 = arith.mulf %56, %58 : vector<8x1xf32>
    %60 = arith.addf %54, %59 : vector<8x1xf32>
    %61 = math.log %60 : vector<8x1xf32>
    %cst_24 = arith.constant -2.000000e+00 : f32
    %62 = vector.broadcast %cst_24 : f32 to vector<8x1xf32>
    %63 = arith.mulf %62, %61 : vector<8x1xf32>
    %64 = vector.broadcast %7 : vector<8x1xf32> to vector<8x32xf32>
    %65 = arith.subf %2, %64 : vector<8x32xf32>
    %66 = vector.broadcast %48 : vector<8x1xf32> to vector<8x32xf32>
    %67 = arith.subf %65, %66 : vector<8x32xf32>
    %cst_25 = arith.constant 5.000000e-01 : f32
    %68 = vector.broadcast %cst_25 : f32 to vector<8x32xf32>
    %69 = arith.mulf %68, %67 : vector<8x32xf32>
    %70 = vector.broadcast %9 : vector<8x1xf32> to vector<8x32xf32>
    %71 = arith.subf %1, %70 : vector<8x32xf32>
    %72 = vector.broadcast %49 : vector<8x1xf32> to vector<8x32xf32>
    %73 = arith.subf %71, %72 : vector<8x32xf32>
    %cst_26 = arith.constant 5.000000e-01 : f32
    %74 = vector.broadcast %cst_26 : f32 to vector<8x32xf32>
    %75 = arith.mulf %74, %73 : vector<8x32xf32>
    %76 = arith.addf %69, %75 : vector<8x32xf32>
    %77 = math.exp %76 : vector<8x32xf32>
    %cst_27 = arith.constant 0.000000e+00 : f32
    %78 = vector.broadcast %cst_27 : f32 to vector<8x32xf32>
    %79 = arith.select %5, %78, %77 : vector<8x32xi1>, vector<8x32xf32>
    %cst_28 = arith.constant dense<0.000000e+00> : vector<8xf32>
    %80 = vector.multi_reduction <add>, %79, %cst_28 [1] : vector<8x32xf32> to vector<8xf32>
    %81 = vector.shape_cast %80 : vector<8xf32> to vector<8x1xf32>
    %cst_29 = arith.constant 9.99999997E-7 : f32
    %82 = vector.broadcast %cst_29 : f32 to vector<8x1xf32>
    %83 = arith.addf %81, %82 : vector<8x1xf32>
    %84 = math.log %83 : vector<8x1xf32>
    %cst_30 = arith.constant -2.000000e+00 : f32
    %85 = vector.broadcast %cst_30 : f32 to vector<8x1xf32>
    %86 = arith.mulf %85, %84 : vector<8x1xf32>
    %cst_31 = arith.constant 1.000000e+00 : f32
    %87 = vector.broadcast %cst_31 : f32 to vector<8x1xf32>
    %88 = arith.mulf %87, %63 : vector<8x1xf32>
    %cst_32 = arith.constant 1.000000e+00 : f32
    %89 = vector.broadcast %cst_32 : f32 to vector<8x1xf32>
    %90 = arith.mulf %89, %86 : vector<8x1xf32>
    %91 = arith.addf %88, %90 : vector<8x1xf32>
    %c8_i32 = arith.constant 8 : i32
    %92 = arith.muli %arg0, %c8_i32 : i32
    %93 = tpu.iota {dimensions = array<i32: 0>} : vector<8x1xi32>
    %94 = vector.broadcast %92 : i32 to vector<8x1xi32>
    %95 = arith.addi %94, %93 : vector<8x1xi32>
    %c8_i32_33 = arith.constant 8 : i32
    %96 = vector.broadcast %c8_i32_33 : i32 to vector<8x1xi32>
    %97 = arith.cmpi slt, %95, %96 : vector<8x1xi32>
    %cst_34 = arith.constant 0.000000e+00 : f32
    %98 = vector.broadcast %cst_34 : f32 to vector<8x1xf32>
    %99 = arith.select %97, %91, %98 : vector<8x1xi1>, vector<8x1xf32>
    %100 = vector.shape_cast %99 : vector<8x1xf32> to vector<1x8x1xf32>
    %cst_35 = arith.constant dense<0.000000e+00> : vector<1xf32>
    %101 = vector.multi_reduction <add>, %100, %cst_35 [1, 2] : vector<1x8x1xf32> to vector<1xf32>
    %102 = vector.shape_cast %101 : vector<1xf32> to vector<1x1x1xf32>
    %103 = vector.extract %102[0, 0, 0] : f32 from vector<1x1x1xf32>
    %104 = arith.index_cast %arg0 : i32 to index
    %c0_36 = arith.constant 0 : index
    %105 = memref.load %arg4[%104, %c0_36] : memref<1x1xf32, #tpu.memory_space<smem>>
    memref.store %103, %arg4[%104, %c0_36] : memref<1x1xf32, #tpu.memory_space<smem>>
    return
  }
  func.func @transform_0(%arg0: i32) -> (i32, i32) {
    %c0_i32 = arith.constant 0 : i32
    %c0_i32_0 = arith.constant 0 : i32
    return %arg0, %c0_i32 : i32, i32
  }
  func.func @transform_1(%arg0: i32) -> (i32, i32) {
    %c0_i32 = arith.constant 0 : i32
    %c0_i32_0 = arith.constant 0 : i32
    return %arg0, %c0_i32 : i32, i32
  }
  func.func @transform_2(%arg0: i32) -> (i32, i32) {
    %c0_i32 = arith.constant 0 : i32
    %c0_i32_0 = arith.constant 0 : i32
    return %arg0, %c0_i32 : i32, i32
  }
  func.func @transform_3(%arg0: i32) -> (i32, i32) {
    %c0_i32 = arith.constant 0 : i32
    %c0_i32_0 = arith.constant 0 : i32
    %c0_i32_1 = arith.constant 0 : i32
    return %c0_i32, %c0_i32_0 : i32, i32
  }
}

</mosaic_0001>

<bundles_post_ra>
// kernel: tpu_custom_call.1
= control target key start
LH: loop header
LB: loop body
LE: loop exit
PB: predicated region body
PF: predicated region fallthrough
CT: control target
= control target key end

     0   :  { %vm24_vm0 = vcmask 261120   ;;  %v229_v4 = vmov 0   ;;  %s352_s0 = inlined_call_operand.vmem [shape: s32[8,1], index: 0, kind: input, shape index: {}]   ;;  %s353_s1 = inlined_call_operand.vmem [shape: f32[8,32], index: 1, kind: input, shape index: {}]   ;;  %s354_s2 = inlined_call_operand.vmem [shape: f32[8,32], index: 2, kind: input, shape index: {}]   ;;  %s355_s3 = inlined_call_operand.hbm [shape: f32[1,1], index: 3, kind: output, shape index: {}]  }
   0x1   :  { %v17_v0 = vld [vmem:[%s354_s2] sm:$0xff]  ;;  %189 = vset.pattern.permute.xlu1 %v229_v4  ;;  %190 = vset.pattern.permute.xlu0 %v229_v4 }
   0x2   :  { %v16_v1 = vld [vmem:[%s353_s1] sm:$0xff]  ;;  %v25_v3 = vsel %vm24_vm0, %v17_v0, -inf }
   0x3   :  { %v15_v2 = vld [vmem:[%s352_s0] sm:$0xff] }
   0x4   :  { %8 = vsyncpa [#allocation3], 0  ;;  %26 = vmax.xlane.f32.xlu0 %v25_v3  ;;  %21 = vperm.xlu1 %189, %v15_v2   ;;  %v28_v5 = vsel %vm24_vm0, %v16_v1, -inf  ;;  %v18_v12 = vlaneseq  ;;  %s217_s18 = scalar_lea.hbm %s355_s3, 16 }
   0x5   :  { %p218_p0 = scmp.ne.s32.totalorder %s355_s3, %s217_s18  ;;  %p221_p1 = scmp.lt.u32.totalorder %s217_s18, %s355_s3 }
   0x6   :  { %v268_v13 = vand.u32 127, %v18_v12 }
   0x7   :  { %p223_p2 = pnand %p221_p1, %p218_p0 }
   0x8   :  { %29 = vmax.xlane.f32.xlu0 %v28_v5 }
  0x83   :  { %v270_v15 = vpop.permute.xlu1 %21 }
  0x84   :  { %vm23_vm1 = vcmp.eq.s32.totalorder %v268_v13, %v270_v15 }
  0x91   :  { %v27_v6 = vpop.xlane.xlu0 %26 }
  0x92   :  { %v262_v7 = vsub.f32 %v17_v0, %v27_v6 }
  0x94   :  { %v32_v8 = vmul.f32 1.442695, %v262_v7 }
  0x95   :  { %v30_v9 = vpop.xlane.xlu0 %29 }
  0x96   :  { %191 = vpow2.f32 %v32_v8  ;;  %v265_v10 = vsub.f32 %v16_v1, %v30_v9 }
  0x98   :  { %v35_v11 = vmul.f32 1.442695, %v265_v10 }
  0x9a   :  { %193 = vpow2.f32 %v35_v11 }
  0xa0   :  { %v192_v14 = vpop.eup %191 }
  0xa1   :  { %v37_v16 = vsel %vm24_vm0, %v192_v14, 0.0  ;;  %v43_v19 = vsel %vm23_vm1, %v192_v14, 0.0 }
  0xa2   :  { %38 = vadd.xlane.f32.xlu1 %v37_v16  ;;  %v44_v20 = vsel %vm24_vm0, %v43_v19, 0.0 }
  0xa4   :  { %v194_v17 = vpop.eup %193 }
  0xa5   :  { %v40_v18 = vsel %vm24_vm0, %v194_v17, 0.0  ;;  %v47_v21 = vsel %vm23_vm1, %v194_v17, 0.0 }
  0xa6   :  { %41 = vadd.xlane.f32.xlu0 %v40_v18  ;;  %v48_v22 = vsel %vm24_vm0, %v47_v21, 0.0 }
  0xaa   :  { %45 = vadd.xlane.f32.xlu0 %v44_v20 }
  0xae   :  { %49 = vadd.xlane.f32.xlu0 %v48_v22 }
 0x12f   :  { %v39_v23 = vpop.xlane.xlu1 %38 }
 0x130   :  { %195 = vrcp.f32 %v39_v23 }
 0x133   :  { %v42_v24 = vpop.xlane.xlu0 %41 }
 0x134   :  { %197 = vrcp.f32 %v42_v24 }
 0x137   :  { %v46_v25 = vpop.xlane.xlu0 %45 }
 0x138   :  { %v61_v26 = vsub.f32 %v39_v23, %v46_v25 }
 0x13a   :  { %v196_v27 = vpop.eup %195  ;;  %v62_v28 = vmax.f32 %v61_v26, 1e-30 }
 0x13b   :  { %v52_v29 = vmul.f32 %v196_v27, %v46_v25  ;;  %v50_v30 = vpop.xlane.xlu0 %49 }
 0x13c   :  { %199 = vlog2.f32 %v62_v28  ;;  %v63_v31 = vsub.f32 %v42_v24, %v50_v30 }
 0x13d   :  { %v55_v32 = vadd.f32 1e-06, %v52_v29  ;;  %v56_v33 = vsub.f32 1.0, %v52_v29 }
 0x13e   :  { %v198_v34 = vpop.eup %197  ;;  %v64_v35 = vmax.f32 %v63_v31, 1e-30 }
 0x13f   :  { %v284_v36 = vadd.f32 1e-06, %v56_v33  ;;  %v54_v37 = vmul.f32 %v198_v34, %v50_v30  ;;  %v131_v43 = vand.u32 2147483647, %v55_v32  ;;  %vm129_vm2 = vcmp.eq.f32.partialorder %v55_v32, 0.0 }
 0x140   :  { %201 = vlog2.f32 %v64_v35  ;;  %vm130_vm3 = vcmp.lt.f32.partialorder %v55_v32, 0.0  ;;  %vm135_vm4 = vcmp.eq.f32.partialorder %v55_v32, inf  ;;  %v138_v46 = vand.u32 2147483648, %v55_v32 }
 0x141   :  { %v58_v38 = vadd.f32 1e-06, %v54_v37  ;;  %v59_v39 = vsub.f32 1.0, %v54_v37  ;;  %203 = vrsqrt.f32 %v55_v32  ;;  %vm291_vm5 = vcmp.eq.f32.partialorder %v131_v43, inf }
 0x142   :  { %205 = vrsqrt.f32 %v284_v36  ;;  %vm157_vm6 = vcmp.eq.f32.partialorder %v284_v36, 0.0  ;;  %vm158_vm7 = vcmp.lt.f32.partialorder %v284_v36, 0.0  ;;  %v159_v53 = vand.u32 2147483647, %v284_v36 }
 0x143   :  { %v287_v40 = vadd.f32 1e-06, %v59_v39  ;;  %207 = vrsqrt.f32 %v58_v38  ;;  %vm143_vm8 = vcmp.eq.f32.partialorder %v58_v38, 0.0  ;;  %v145_v52 = vand.u32 2147483647, %v58_v38 }
 0x144   :  { %vm144_vm9 = vcmp.lt.f32.partialorder %v58_v38, 0.0  ;;  %vm149_vm10 = vcmp.eq.f32.partialorder %v58_v38, inf  ;;  %vm163_vm11 = vcmp.eq.f32.partialorder %v284_v36, inf  ;;  %v166_v59 = vand.u32 2147483648, %v284_v36 }
 0x145   :  { %209 = vrsqrt.f32 %v287_v40  ;;  %vm306_vm12 = vcmp.eq.f32.partialorder %v145_v52, inf  ;;  %v152_v3 = vand.u32 2147483648, %v58_v38  ;;  %vm171_vm13 = vcmp.eq.f32.partialorder %v287_v40, 0.0 }
 0x146   :  { %v200_v41 = vpop.eup %199  ;;  %vm177_vm14 = vcmp.eq.f32.partialorder %v287_v40, inf  ;;  %v180_v16 = vand.u32 2147483648, %v287_v40  ;;  %vm172_vm15 = vcmp.lt.f32.partialorder %v287_v40, 0.0 }
 0x147   :  { %v66_v42 = vmul.f32 0.6931472, %v200_v41 }
 0x149   :  { %v79_v45 = vsub.f32 %v262_v7, %v66_v42 }
 0x14a   :  { %v202_v44 = vpop.eup %201 }
 0x14b   :  { %v204_v47 = vpop.eup %203  ;;  %v68_v48 = vmul.f32 0.6931472, %v202_v44  ;;  %v80_v57 = vmul.f32 0.5, %v79_v45 }
 0x14c   :  { %v206_v50 = vpop.eup %205  ;;  %v134_v51 = vmul.f32 %v204_v47, %v55_v32 }
 0x14d   :  { %v81_v54 = vsub.f32 %v265_v10, %v68_v48  ;;  %v162_v55 = vmul.f32 %v206_v50, %v284_v36  ;;  %v208_v56 = vpop.eup %207  ;;  %v173_v10 = vand.u32 2147483647, %v287_v40 }
 0x14e   :  { %v136_v58 = vsel %vm135_vm4, %v55_v32, %v134_v51  ;;  %v148_v62 = vmul.f32 %v208_v56, %v58_v38  ;;  %vm102_vm4 = vcmask 7168  }
 0x14f   :  { %v82_v60 = vmul.f32 0.5, %v81_v54  ;;  %v139_v61 = vsel %vm129_vm2, %v138_v46, %v136_v58  ;;  %v164_v63 = vsel %vm163_vm11, %v284_v36, %v162_v55  ;;  %v210_v0 = vpop.eup %209 }
 0x150   :  { %v140_v1 = vsel %vm130_vm3, nan, %v139_v61  ;;  %v167_v4 = vsel %vm157_vm6, %v166_v59, %v164_v63  ;;  %v150_v7 = vsel %vm149_vm10, %v58_v38, %v148_v62  ;;  %v176_v11 = vmul.f32 %v210_v0, %v287_v40 }
 0x151   :  { %v83_v5 = vadd.f32 %v82_v60, %v80_v57  ;;  %v141_v6 = vsel %vm129_vm2, 0.0, %v140_v1  ;;  %v153_v8 = vsel %vm143_vm8, %v152_v3, %v150_v7  ;;  %v168_v9 = vsel %vm158_vm7, nan, %v167_v4 }
 0x152   :  { %v154_v14 = vsel %vm144_vm9, nan, %v153_v8  ;;  %v142_v17 = vsel %vm291_vm5, inf, %v141_v6  ;;  %v178_v19 = vsel %vm177_vm14, %v287_v40, %v176_v11  ;;  %v169_v21 = vsel %vm157_vm6, 0.0, %v168_v9 }
 0x153   :  { %v84_v12 = vmul.f32 1.442695, %v83_v5  ;;  %v155_v18 = vsel %vm143_vm8, 0.0, %v154_v14  ;;  %v181_v22 = vsel %vm171_vm13, %v180_v16, %v178_v19  ;;  %vm160_vm2 = vcmp.eq.f32.partialorder %v159_v53, inf }
 0x154   :  { %v156_v20 = vsel %vm306_vm12, inf, %v155_v18  ;;  %v182_v24 = vsel %vm172_vm15, nan, %v181_v22  ;;  %vm174_vm3 = vcmp.eq.f32.partialorder %v173_v10, inf  ;;  %v170_v26 = vsel %vm160_vm2, inf, %v169_v21 }
 0x155   :  { %211 = vpow2.f32 %v84_v12  ;;  %v71_v23 = vmul.f32 %v156_v20, %v142_v17  ;;  %v183_v25 = vsel %vm171_vm13, 0.0, %v182_v24 }
 0x156   :  { %v184_v27 = vsel %vm174_vm3, inf, %v183_v25 }
 0x157   :  { %v74_v28 = vmul.f32 %v184_v27, %v170_v26 }
 0x159   :  { %v75_v29 = vadd.f32 %v74_v28, %v71_v23 }
 0x15b   :  { %213 = vlog2.f32 %v75_v29 }
 0x15f   :  { %v212_v30 = vpop.eup %211 }
 0x160   :  { %v86_v31 = vsel %vm23_vm1, 0.0, %v212_v30 }
 0x161   :  { %v87_v32 = vsel %vm24_vm0, %v86_v31, 0.0 }
 0x162   :  { %88 = vadd.xlane.f32.xlu0 %v87_v32 }
 0x165   :  { %v214_v35 = vpop.eup %213 }
 0x166   :  { %v77_v36 = vmul.f32 0.6931472, %v214_v35 }
 0x168   :  { %v78_v40 = vmul.f32 -2.0, %v77_v36 }
 0x1ef   :  { %v89_v33 = vpop.xlane.xlu0 %88 }
 0x1f0   :  { %v90_v34 = vadd.f32 1e-06, %v89_v33 }
 0x1f2   :  { %215 = vlog2.f32 %v90_v34 }
 0x1fc   :  { %v216_v37 = vpop.eup %215 }
 0x1fd   :  { %v92_v38 = vmul.f32 0.6931472, %v216_v37 }
 0x1ff   :  { %v93_v39 = vmul.f32 -2.0, %v92_v38 }
 0x201   :  { %v94_v41 = vadd.f32 %v93_v39, %v78_v40 }
 0x203   :  { %v103_v42 = vsel %vm102_vm4, %v94_v41, 0.0 }
 0x204   :  { %104 = vadd.xlane.f32.xlu0 %v103_v42 }
 0x291   :  { %v105_v43 = vpop.xlane.xlu0 %104 }
 0x292   :  { %v106_v13 = vrot.slane %v105_v43, 4 }
 0x294   :  { %v107_v15 = vadd.f32 %v106_v13, %v105_v43 }
 0x296   :  { %v108_v44 = vrot.slane %v107_v15, 2 }
 0x298   :  { %v109_v45 = vadd.f32 %v108_v44, %v107_v15 }
 0x29a   :  { %v110_v46 = vrot.slane %v109_v45, 1 }
 0x29c   :  { %v111_v47 = vadd.f32 %v110_v46, %v109_v45 }
 0x29e   :  { %185 = vpush %v111_v47 }
 0x2cf   :  { %s186_s0 = spop %185 }
 0x2d0   :  { %115 = sst [smem:[#allocation2]] %s186_s0 }
 0x2d1   :  { %226 = shalt.err (!%p223_p2)
}
 0x2d2   :  { %s230_s23 = smov [#allocation2]  }
 0x2d3   :  { %123 = dma.smem_to_hbm %s230_s23, 16, %s355_s3, [#allocation3]  }
 0x2d4   :  { %227 = dma.done.wait [#allocation3], 16  }
 0x2d5   :  { %228 = vsyncadd [#allocation3], 4294967280 }
 0x2d6   :  { %127 = sfence }
 0x2d7   :  { %128 = vsyncpa [#allocation3], 1 }

</bundles_post_ra>
